<compile_context>
chip_gen: v6e
topology: v6e:2x2x1
jax: 0.10.0
libtpu: 0.0.40
codegen_flags: <defaults>
</compile_context>

<pallas_src>
import jax
import jax.numpy as jnp
from jax.experimental import pallas as pl
from jax.experimental.pallas import tpu as pltpu

IN_FEATURES = 100
OUT_FEATURES = 10
OUT_PACK = 32            # packed output width: [sum | x | y | pad] in lanes 0..31
MAX_BLOCK_ROWS = 8192    # ~24 MiB double-buffered working set -> fits every chip


def _round_up(n, m):
    return ((n + m - 1) // m) * m


def _choose_tile(batch):
    # Aim for >=4 grid steps on large batches (2 steps per v7x TensorCore and
    # real input/output DMA pipelining on every chip), capped at MAX_BLOCK_ROWS
    # so the double-buffered x/y/out tiles stay well inside VMEM.
    rows = _round_up(pl.cdiv(batch, 4), 8)
    return max(8, min(MAX_BLOCK_ROWS, rows))


def _multi_input_kernel(x_ref, y_ref, wx_ref, wy_ref, b_ref, out_ref):
    # int32 -> f32 cast (matches x.float() in the PyTorch module).
    x_f32 = x_ref[...].astype(jnp.float32)
    # Two MXU matmuls against fused [100, 32] weight slabs, one bias add,
    # one [TB, 32] store:
    #   cols  0:10 -> x@w1 + y@w2 + (b1+b2)   (sum head)
    #   cols 10:20 -> x@w1 + b1               (x head)
    #   cols 20:30 -> y@w2 + b2               (y head)
    acc = jnp.dot(x_f32, wx_ref[...], preferred_element_type=jnp.float32)
    acc = acc + jnp.dot(y_ref[...], wy_ref[...], preferred_element_type=jnp.float32)
    out_ref[...] = acc + b_ref[...]


def fuse_params(w1, b1, w2, b2):
    """Build the fused weight/bias slabs ONCE (static functions of the params)."""
    o = OUT_FEATURES
    wx = jnp.zeros((IN_FEATURES, OUT_PACK), jnp.float32)
    wx = wx.at[:, 0:o].set(w1).at[:, o:2 * o].set(w1)
    wy = jnp.zeros((IN_FEATURES, OUT_PACK), jnp.float32)
    wy = wy.at[:, 0:o].set(w2).at[:, 2 * o:3 * o].set(w2)
    bb = jnp.zeros((1, OUT_PACK), jnp.float32)
    bb = (bb.at[:, 0:o].set(b1 + b2)
            .at[:, o:2 * o].set(b1)
            .at[:, 2 * o:3 * o].set(b2))
    return wx, wy, bb


def multi_input_forward(x_int32, y_f32, wx, wy, bb):
    """x_int32: [B, 100] int32, y_f32: [B, 100] f32, fused slabs from fuse_params.
    Returns (x_out + y_out, x_out, y_out), each [B, 10] f32."""
    batch = x_int32.shape[0]
    tb = _choose_tile(batch)
    grid = (pl.cdiv(batch, tb),)   # partial last block handled by Pallas (masked writes)

    cost = pl.CostEstimate(
        flops=2 * 2 * batch * IN_FEATURES * OUT_PACK,        # two [TB,100]x[100,32] matmuls
        transcendentals=0,
        bytes_accessed=(batch * IN_FEATURES * 4 * 2          # x (int32) + y (f32) streamed in
                        + batch * OUT_PACK * 4               # packed output slab
                        + 2 * IN_FEATURES * OUT_PACK * 4     # weight slabs (loaded once)
                        + OUT_PACK * 4),                     # bias slab
    )

    out = pl.pallas_call(
        _multi_input_kernel,
        out_shape=jax.ShapeDtypeStruct((batch, OUT_PACK), jnp.float32),
        grid=grid,
        in_specs=[
            pl.BlockSpec((tb, IN_FEATURES), lambda i: (i, 0)),         # x tile (streamed)
            pl.BlockSpec((tb, IN_FEATURES), lambda i: (i, 0)),         # y tile (streamed)
            pl.BlockSpec((IN_FEATURES, OUT_PACK), lambda i: (0, 0)),   # wx (VMEM-resident)
            pl.BlockSpec((IN_FEATURES, OUT_PACK), lambda i: (0, 0)),   # wy (VMEM-resident)
            pl.BlockSpec((1, OUT_PACK), lambda i: (0, 0)),             # bias (VMEM-resident)
        ],
        out_specs=pl.BlockSpec((tb, OUT_PACK), lambda i: (i, 0)),
        compiler_params=pltpu.CompilerParams(
            dimension_semantics=("parallel",),       # shard batch tiles across cores (v7x)
            vmem_limit_bytes=48 * 1024 * 1024,       # safe on v7x (64 MiB physical)
        ),
        cost_estimate=cost,
    )(x_int32, y_f32, wx, wy, bb)

    o = OUT_FEATURES
    return out[:, 0:o], out[:, o:2 * o], out[:, 2 * o:3 * o]


def init_params(key):
    """Deterministic init matching torch.nn.Linear's U(-1/sqrt(in), 1/sqrt(in))."""
    k1, k2, k3, k4 = jax.random.split(key, 4)
    bound = 1.0 / (IN_FEATURES ** 0.5)
    # Weights stored as [in, out] for the kernel's x @ W layout.
    w1 = jax.random.uniform(k1, (IN_FEATURES, OUT_FEATURES), jnp.float32, -bound, bound)
    b1 = jax.random.uniform(k2, (1, OUT_FEATURES), jnp.float32, -bound, bound)
    w2 = jax.random.uniform(k3, (IN_FEATURES, OUT_FEATURES), jnp.float32, -bound, bound)
    b2 = jax.random.uniform(k4, (1, OUT_FEATURES), jnp.float32, -bound, bound)
    return w1, b1, w2, b2


if __name__ == "__main__":
    key = jax.random.PRNGKey(0)
    kp, kx, ky = jax.random.split(key, 3)

    batch = 2
    w1, b1, w2, b2 = init_params(kp)
    wx, wy, bb = fuse_params(w1, b1, w2, b2)   # built once, outside the hot path

    # x is an int32 input (like torch.zeros([100], dtype=torch.int32).unsqueeze(0)),
    # y is float32 — small deterministic test values.
    x = jax.random.randint(kx, (batch, IN_FEATURES), -5, 5, dtype=jnp.int32)
    y = jax.random.normal(ky, (batch, IN_FEATURES), dtype=jnp.float32)

    fwd = jax.jit(multi_input_forward)
    out_sum, out_x, out_y = fwd(x, y, wx, wy, bb)
    jax.block_until_ready((out_sum, out_x, out_y))

    # Reference check in plain JAX.
    ref_x = x.astype(jnp.float32) @ w1 + b1
    ref_y = y @ w2 + b2
    assert out_x.shape == (batch, OUT_FEATURES) and out_x.dtype == jnp.float32
    assert out_sum.shape == (batch, OUT_FEATURES) and out_y.shape == (batch, OUT_FEATURES)
    assert jnp.allclose(out_x, ref_x, atol=1e-5)
    assert jnp.allclose(out_y, ref_y, atol=1e-5)
    assert jnp.allclose(out_sum, ref_x + ref_y, atol=1e-5)

    print("KERNEL_OK")
</pallas_src>

<mosaic_0001>
module attributes {stable_mosaic.version = 11 : i64} {
  func.func @_multi_input_kernel(%arg0: i32, %arg1: memref<8x100xi32, #tpu.memory_space<vmem>>, %arg2: memref<8x100xf32, #tpu.memory_space<vmem>>, %arg3: memref<100x32xf32, #tpu.memory_space<vmem>>, %arg4: memref<100x32xf32, #tpu.memory_space<vmem>>, %arg5: memref<1x32xf32, #tpu.memory_space<vmem>>, %arg6: memref<8x32xf32, #tpu.memory_space<vmem>>) attributes {dimension_semantics = [#tpu.dimension_semantics<parallel>], iteration_bounds = array<i64: 1>, scalar_prefetch = 0 : i64, scratch_operands = 0 : i64, tpu.core_type = #tpu.core_type<tc>, window_params = [{transform_indices = @transform_0, window_bounds = array<i64: 8, 100>}, {transform_indices = @transform_1, window_bounds = array<i64: 8, 100>}, {pipeline_mode = #tpu.pipeline_mode<synchronous>, transform_indices = @transform_2, window_bounds = array<i64: 100, 32>}, {pipeline_mode = #tpu.pipeline_mode<synchronous>, transform_indices = @transform_3, window_bounds = array<i64: 100, 32>}, {pipeline_mode = #tpu.pipeline_mode<synchronous>, transform_indices = @transform_4, window_bounds = array<i64: 1, 32>}, {transform_indices = @transform_5, window_bounds = array<i64: 8, 32>}]} {
    %c0 = arith.constant 0 : index
    %c0_0 = arith.constant 0 : index
    %0 = vector.load %arg1[%c0, %c0_0] : memref<8x100xi32, #tpu.memory_space<vmem>>, vector<8x100xi32>
    %1 = arith.sitofp %0 : vector<8x100xi32> to vector<8x100xf32>
    %c0_1 = arith.constant 0 : index
    %c0_2 = arith.constant 0 : index
    %2 = vector.load %arg3[%c0_1, %c0_2] : memref<100x32xf32, #tpu.memory_space<vmem>>, vector<100x32xf32>
    %cst = arith.constant dense<0.000000e+00> : vector<8x32xf32>
    %3 = tpu.matmul %1, %2, %cst {dimension_numbers = #tpu.dot_dimension_numbers<[1], [0], [0], [1], [0, 0, 1, 1], [], []>} : vector<8x100xf32>, vector<100x32xf32>, vector<8x32xf32> -> vector<8x32xf32>
    %c0_3 = arith.constant 0 : index
    %c0_4 = arith.constant 0 : index
    %4 = vector.load %arg2[%c0_3, %c0_4] : memref<8x100xf32, #tpu.memory_space<vmem>>, vector<8x100xf32>
    %c0_5 = arith.constant 0 : index
    %c0_6 = arith.constant 0 : index
    %5 = vector.load %arg4[%c0_5, %c0_6] : memref<100x32xf32, #tpu.memory_space<vmem>>, vector<100x32xf32>
    %cst_7 = arith.constant dense<0.000000e+00> : vector<8x32xf32>
    %6 = tpu.matmul %4, %5, %cst_7 {dimension_numbers = #tpu.dot_dimension_numbers<[1], [0], [0], [1], [0, 0, 1, 1], [], []>} : vector<8x100xf32>, vector<100x32xf32>, vector<8x32xf32> -> vector<8x32xf32>
    %7 = arith.addf %3, %6 : vector<8x32xf32>
    %c0_8 = arith.constant 0 : index
    %c0_9 = arith.constant 0 : index
    %8 = vector.load %arg5[%c0_8, %c0_9] : memref<1x32xf32, #tpu.memory_space<vmem>>, vector<1x32xf32>
    %9 = vector.broadcast %8 : vector<1x32xf32> to vector<8x32xf32>
    %10 = arith.addf %7, %9 : vector<8x32xf32>
    %c0_10 = arith.constant 0 : index
    %c0_11 = arith.constant 0 : index
    %11 = vector.load %arg6[%c0_10, %c0_11] : memref<8x32xf32, #tpu.memory_space<vmem>>, vector<8x32xf32>
    tpu.vector_store %arg6[%c0_10, %c0_11], %10 {strides = array<i32>} : memref<8x32xf32, #tpu.memory_space<vmem>>, vector<8x32xf32>,
    return
  }
  func.func @transform_0(%arg0: i32) -> (i32, i32) {
    %c0_i32 = arith.constant 0 : i32
    %c0_i32_0 = arith.constant 0 : i32
    return %arg0, %c0_i32 : i32, i32
  }
  func.func @transform_1(%arg0: i32) -> (i32, i32) {
    %c0_i32 = arith.constant 0 : i32
    %c0_i32_0 = arith.constant 0 : i32
    return %arg0, %c0_i32 : i32, i32
  }
  func.func @transform_2(%arg0: i32) -> (i32, i32) {
    %c0_i32 = arith.constant 0 : i32
    %c0_i32_0 = arith.constant 0 : i32
    %c0_i32_1 = arith.constant 0 : i32
    return %c0_i32, %c0_i32_0 : i32, i32
  }
  func.func @transform_3(%arg0: i32) -> (i32, i32) {
    %c0_i32 = arith.constant 0 : i32
    %c0_i32_0 = arith.constant 0 : i32
    %c0_i32_1 = arith.constant 0 : i32
    return %c0_i32, %c0_i32_0 : i32, i32
  }
  func.func @transform_4(%arg0: i32) -> (i32, i32) {
    %c0_i32 = arith.constant 0 : i32
    %c0_i32_0 = arith.constant 0 : i32
    %c0_i32_1 = arith.constant 0 : i32
    return %c0_i32, %c0_i32_0 : i32, i32
  }
  func.func @transform_5(%arg0: i32) -> (i32, i32) {
    %c0_i32 = arith.constant 0 : i32
    %c0_i32_0 = arith.constant 0 : i32
    return %arg0, %c0_i32 : i32, i32
  }
}

</mosaic_0001>

<bundles_post_ra>
// kernel: multi_input_forward.1
= control target key start
LH: loop header
LB: loop body
LE: loop exit
PB: predicated region body
PF: predicated region fallthrough
CT: control target
= control target key end

     0   :  { %vm53_vm0 = vcmask 1043456   ;;  %v347_v2 = vmov 0.0   ;;  %vm49_vm1 = vcmask 818176   ;;  %vm348_vm2 = vmmov 0   ;;  %s497_s0 = inlined_call_operand.vmem [shape: s32[2,100], index: 0, kind: input, shape index: {}]   ;;  %s498_s1 = inlined_call_operand.vmem [shape: f32[2,100], index: 1, kind: input, shape index: {}]   ;;  %s499_s2 = inlined_call_operand.vmem [shape: f32[100,32], index: 2, kind: input, shape index: {}]   ;;  %s500_s3 = inlined_call_operand.vmem [shape: f32[100,32], index: 3, kind: input, shape index: {}]   ;;  %s501_s4 = inlined_call_operand.vmem [shape: f32[1,32], index: 4, kind: input, shape index: {}]   ;;  %s502_s5 = inlined_call_operand.vmem [shape: f32[2,32], index: 5, kind: output, shape index: {}]  }
   0x1   :  { %v48_v0 = vld [vmem:[%s500_s3 + $0x60] sm:$0xf]  ;;  %287 = vmatprep.subr.mxu0 %v347_v2  ;;  %316 = vmatprep.subr.mxu1 %v347_v2  ;;  %v47_v3 = vld [vmem:[%s500_s3 + $0x58] sm:$0xff]  ;;  %v46_v5 = vld [vmem:[%s500_s3 + $0x50] sm:$0xff]  ;;  %vm211_vm3 = vcmask 261120  }
   0x2   :  { %v34_v1 = vld [vmem:[%s499_s2 + $0x60] sm:$0xf]  ;;  %v33_v4 = vld [vmem:[%s499_s2 + $0x58] sm:$0xff]  ;;  %288 = vmatpush3.msk.msra.mxu0 %vm53_vm0, %v48_v0  ;;  %v32_v6 = vld [vmem:[%s499_s2 + $0x50] sm:$0xff]  ;;  %313 = vmatprep.mubr.msk.f32.mxu0 %vm348_vm2, %v347_v2 }
   0x3   :  { %317 = vmatpush3.msk.msra.mxu1 %vm53_vm0, %v34_v1  ;;  %289 = vmatprep.subr.mxu0 %v347_v2  ;;  %v45_v7 = vld [vmem:[%s500_s3 + $0x48] sm:$0xff]  ;;  %v44_v9 = vld [vmem:[%s500_s3 + $0x40] sm:$0xff]  ;;  %v43_v11 = vld [vmem:[%s500_s3 + $0x38] sm:$0xff] }
   0x4   :  { %318 = vmatprep.subr.mxu1 %v347_v2  ;;  %290 = vmatpush3.msra.mxu0 %v47_v3  ;;  %v31_v8 = vld [vmem:[%s499_s2 + $0x48] sm:$0xff]  ;;  %v30_v10 = vld [vmem:[%s499_s2 + $0x40] sm:$0xff]  ;;  %v29_v12 = vld [vmem:[%s499_s2 + $0x38] sm:$0xff] }
   0x5   :  { %319 = vmatpush3.msra.mxu1 %v33_v4  ;;  %291 = vmatprep.subr.mxu0 %v347_v2  ;;  %v42_v13 = vld [vmem:[%s500_s3 + $0x30] sm:$0xff]  ;;  %v41_v15 = vld [vmem:[%s500_s3 + $0x28] sm:$0xff]  ;;  %v40_v17 = vld [vmem:[%s500_s3 + $0x20] sm:$0xff] }
   0x6   :  { %320 = vmatprep.subr.mxu1 %v347_v2  ;;  %292 = vmatpush3.msra.mxu0 %v46_v5  ;;  %v28_v14 = vld [vmem:[%s499_s2 + $0x30] sm:$0xff]  ;;  %v27_v16 = vld [vmem:[%s499_s2 + $0x28] sm:$0xff]  ;;  %v26_v18 = vld [vmem:[%s499_s2 + $0x20] sm:$0xff] }
   0x7   :  { %321 = vmatpush3.msra.mxu1 %v32_v6  ;;  %293 = vmatprep.subr.mxu0 %v347_v2  ;;  %v39_v19 = vld [vmem:[%s500_s3 + $0x18] sm:$0xff]  ;;  %v38_v21 = vld [vmem:[%s500_s3 + $0x10] sm:$0xff]  ;;  %v37_v23 = vld [vmem:[%s500_s3 + $0x8] sm:$0xff] }
   0x8   :  { %322 = vmatprep.subr.mxu1 %v347_v2  ;;  %294 = vmatpush3.msra.mxu0 %v45_v7  ;;  %v25_v20 = vld [vmem:[%s499_s2 + $0x18] sm:$0xff]  ;;  %v24_v22 = vld [vmem:[%s499_s2 + $0x10] sm:$0xff]  ;;  %v23_v24 = vld [vmem:[%s499_s2 + $0x8] sm:$0xff] }
   0x9   :  { %323 = vmatpush3.msra.mxu1 %v31_v8  ;;  %295 = vmatprep.subr.mxu0 %v347_v2  ;;  %v20_v25 = vld [vmem:[%s497_s0] sm:$0xff] }
   0xa   :  { %324 = vmatprep.subr.mxu1 %v347_v2  ;;  %296 = vmatpush3.msra.mxu0 %v44_v9  ;;  %v36_v26 = vld [vmem:[%s500_s3] sm:$0xff]  ;;  %v21_v28 = vcvt.s32.f32 %v20_v25 }
   0xb   :  { %325 = vmatpush3.msra.mxu1 %v30_v10  ;;  %297 = vmatprep.subr.mxu0 %v347_v2  ;;  %v22_v27 = vld [vmem:[%s499_s2] sm:$0xff] }
   0xc   :  { %326 = vmatprep.subr.mxu1 %v347_v2  ;;  %298 = vmatpush3.msra.mxu0 %v43_v11  ;;  %v35_v29 = vld [vmem:[%s498_s1] sm:$0xff] }
   0xd   :  { %327 = vmatpush3.msra.mxu1 %v29_v12  ;;  %299 = vmatprep.subr.mxu0 %v347_v2  ;;  %v258_v32 = vld [vmem:[%s501_s4] ss:$0 sm:$0xff] }
   0xe   :  { %328 = vmatprep.subr.mxu1 %v347_v2  ;;  %300 = vmatpush3.msra.mxu0 %v42_v13 }
   0xf   :  { %329 = vmatpush3.msra.mxu1 %v28_v14  ;;  %301 = vmatprep.subr.mxu0 %v347_v2 }
  0x10   :  { %330 = vmatprep.subr.mxu1 %v347_v2  ;;  %302 = vmatpush3.msra.mxu0 %v41_v15 }
  0x11   :  { %331 = vmatpush3.msra.mxu1 %v27_v16  ;;  %303 = vmatprep.subr.mxu0 %v347_v2 }
  0x12   :  { %332 = vmatprep.subr.mxu1 %v347_v2  ;;  %304 = vmatpush3.msra.mxu0 %v40_v17 }
  0x13   :  { %333 = vmatpush3.msra.mxu1 %v26_v18  ;;  %305 = vmatprep.subr.mxu0 %v347_v2 }
  0x14   :  { %334 = vmatprep.subr.mxu1 %v347_v2  ;;  %306 = vmatpush3.msra.mxu0 %v39_v19 }
  0x15   :  { %335 = vmatpush3.msra.mxu1 %v25_v20  ;;  %307 = vmatprep.subr.mxu0 %v347_v2 }
  0x16   :  { %336 = vmatprep.subr.mxu1 %v347_v2  ;;  %308 = vmatpush3.msra.mxu0 %v38_v21 }
  0x17   :  { %337 = vmatpush3.msra.mxu1 %v24_v22  ;;  %309 = vmatprep.subr.mxu0 %v347_v2 }
  0x18   :  { %338 = vmatprep.subr.mxu1 %v347_v2  ;;  %310 = vmatpush3.msra.mxu0 %v37_v23 }
  0x19   :  { %339 = vmatpush3.msra.mxu1 %v23_v24  ;;  %311 = vmatprep.subr.mxu0 %v347_v2 }
  0x1a   :  { %340 = vmatprep.subr.mxu1 %v347_v2  ;;  %312 = vmatpush3.msra.mxu0 %v36_v26 }
  0x1b   :  { %341 = vmatpush3.msra.mxu1 %v22_v27  ;;  %342 = vmatprep.mubr.msk.f32.mxu1 %vm348_vm2, %v347_v2 }
  0x1c   :  { %314 = vmatmul.mubr.msk.f32.vlgmr.msra.gmra.mxu0 %vm49_vm1, %v35_v29  ;;  %343 = vmatmul.mubr.msk.f32.vlgmr.msra.gmra.mxu1 %vm49_vm1, %v21_v28 }
  0xdc   :  { %v123_v30 = vpop.f32.mrf.mxu0  ;;  %v199_v31 = vpop.f32.mrf.mxu1 }
  0xdd   :  { %v200_v33 = vadd.f32 %v199_v31, %v123_v30 }
  0xde   :  { %v315_v34 = vpop.f32.mrf.mxu0  ;;  %v344_v35 = vpop.f32.mrf.mxu1 }
  0xdf   :  { %v210_v36 = vadd.f32 %v258_v32, %v200_v33 }
  0xe1   :  { %212 = vst.msk [vmem:[#allocation2] sm:$0xff] %vm211_vm3, %v210_v36 }
  0xe8   :  { %v231_v37 = vld [vmem:[#allocation2] sm:$0x3] }
  0xe9   :  { %232 = vst [vmem:[%s502_s5] sm:$0x3] %v231_v37 }

</bundles_post_ra>
